<compile_context>
chip_gen: v7x
topology: tpu7x:2x2x1
jax: 0.10.0
libtpu: 0.0.40
codegen_flags: <defaults>
</compile_context>

<pallas_src>
import jax
import jax.numpy as jnp
from jax.experimental import pallas as pl
from jax.experimental.pallas import tpu as pltpu
import numpy as np

# ---- model config (matches SymbolicNetL0.__init__ shapes) --------------------
IN_DIM = 2                      # network input dimension
DEPTH = 2                       # symbolic_depth
N_FUNCS = 5                     # len(funcs): identity, square, sin, cos, product
N_DOUBLE = 1                    # count_double(funcs)
N_SINGLE = N_FUNCS - N_DOUBLE
OUT_DIM = N_FUNCS + N_DOUBLE    # per-layer linear output width (func_in_dim)
GAMMA, ZETA, BETA = -0.1, 1.1, 2.0 / 3.0
DROPRATE_INIT = 0.5
INIT_STDDEV = 0.1

LANE = 128
MAX_TILE_B = 1024               # keeps >=2 parallel grid steps at large batch (v7x)
P_COLS = 2 * IN_DIM + 2 * N_FUNCS + 1   # packed parameter columns = 15


def _round_up(n, m):
    return ((n + m - 1) // m) * m


def _apply_funcs(g):
    """Primitive activation units, evaluated per-row in the transposed layout.

    g: (OUT_DIM, TILE_B).  Returns a list of N_FUNCS lane-dense (1, TILE_B) rows.
    Transcendentals (sin/cos) touch exactly one row each.
    """
    return [
        g[0:1, :],                      # identity
        g[1:2, :] * g[1:2, :],          # square
        jnp.sin(g[2:3, :]),             # sin
        jnp.cos(g[3:4, :]),             # cos
        g[4:5, :] * g[5:6, :],          # product (double-input func)
    ]


def _layer(h_rows, w_t, a_t):
    """One SymbolicLayerL0 (sample=False) in transposed layout via VPU FMAs.

    h_rows: list of (1, TILE_B) rows (length = layer in_dim)
    w_t, a_t: (OUT_DIM, in_dim)  -- weight / qz_log_alpha, pre-transposed.
    """
    # L0 hard-concrete gate mean: clip(sigmoid(alpha)*(zeta-gamma)+gamma, 0, 1)
    z_mean = jnp.clip(jax.nn.sigmoid(a_t) * (ZETA - GAMMA) + GAMMA, 0.0, 1.0)
    w_eff = w_t * z_mean                                   # (OUT_DIM, in_dim)
    # Rank-1 accumulation: g[j, b] = sum_k w_eff[j, k] * h_k[b]
    g = w_eff[:, 0:1] * h_rows[0]                          # (OUT_DIM, TILE_B)
    for k in range(1, len(h_rows)):
        g = g + w_eff[:, k:k + 1] * h_rows[k]
    return _apply_funcs(g)


def _symbolic_net_kernel(x_ref, p_ref, out_ref):
    """Fused depth-2 SymbolicNetL0 forward for one lane-major batch tile.

    x_ref:   (IN_DIM, TILE_B)   input, batch on lanes
    p_ref:   (OUT_DIM, P_COLS)  packed [w0ᵀ | a0ᵀ | w1ᵀ | a1ᵀ | w_out(pad)]
    out_ref: (1, TILE_B)        lane-dense output row
    """
    p = p_ref[...]
    x = x_ref[...]
    h = [x[k:k + 1, :] for k in range(IN_DIM)]

    # layer 0: in_dim = IN_DIM
    w0_t = p[:, 0:IN_DIM]
    a0_t = p[:, IN_DIM:2 * IN_DIM]
    h = _layer(h, w0_t, a0_t)

    # layer 1: in_dim = N_FUNCS
    c = 2 * IN_DIM
    w1_t = p[:, c:c + N_FUNCS]
    a1_t = p[:, c + N_FUNCS:c + 2 * N_FUNCS]
    h = _layer(h, w1_t, a1_t)

    # output projection: y = sum_j w_out[j] * h_j   (5 broadcast FMAs)
    c_out = c + 2 * N_FUNCS
    acc = p[0:1, c_out:c_out + 1] * h[0]
    for j in range(1, N_FUNCS):
        acc = acc + p[j:j + 1, c_out:c_out + 1] * h[j]
    out_ref[...] = acc


def _pack_params(w0, a0, w1, a1, w_out):
    """Pack all parameters into one (OUT_DIM, P_COLS) float32 buffer."""
    w_out_col = jnp.pad(w_out.astype(jnp.float32),
                        ((0, OUT_DIM - N_FUNCS), (0, 0)))          # (6, 1)
    return jnp.concatenate(
        [w0.T.astype(jnp.float32), a0.T.astype(jnp.float32),
         w1.T.astype(jnp.float32), a1.T.astype(jnp.float32),
         w_out_col],
        axis=1)                                                    # (6, 15)


@jax.jit
def symbolic_net_l0_forward(x, w0, a0, w1, a1, w_out):
    b = x.shape[0]
    tile_b = min(MAX_TILE_B, _round_up(b, LANE))
    padded_b = _round_up(b, tile_b)

    params = _pack_params(w0, a0, w1, a1, w_out)                   # (6, 15)
    x_t = jnp.transpose(x.astype(jnp.float32))                     # (IN_DIM, b)
    if padded_b != b:
        x_t = jnp.pad(x_t, ((0, 0), (0, padded_b - b)))

    y_t = pl.pallas_call(
        _symbolic_net_kernel,
        out_shape=jax.ShapeDtypeStruct((1, padded_b), jnp.float32),
        grid_spec=pltpu.PrefetchScalarGridSpec(
            num_scalar_prefetch=0,
            grid=(padded_b // tile_b,),
            in_specs=[
                pl.BlockSpec((IN_DIM, tile_b), lambda i: (0, i)),    # x (transposed)
                pl.BlockSpec((OUT_DIM, P_COLS), lambda i: (0, 0)),   # packed params
            ],
            out_specs=pl.BlockSpec((1, tile_b), lambda i: (0, i)),
        ),
        compiler_params=pltpu.CompilerParams(
            dimension_semantics=("parallel",)),
    )(x_t, params)

    return jnp.transpose(y_t)[:b, :]                               # (b, 1)


def _reference_forward(x, w0, a0, w1, a1, w_out):
    """Pure-JAX replica of the PyTorch forward (sample=False path)."""
    h = x
    for w, a in ((w0, a0), (w1, a1)):
        z = jnp.clip(jax.nn.sigmoid(a) * (ZETA - GAMMA) + GAMMA, 0.0, 1.0)
        g = h @ (w * z)
        h = jnp.stack([g[:, 0], g[:, 1] ** 2, jnp.sin(g[:, 2]),
                       jnp.cos(g[:, 3]), g[:, 4] * g[:, 5]], axis=1)
    return h @ w_out


if __name__ == "__main__":
    key = jax.random.PRNGKey(0)
    k_x, k_x2, k_w0, k_a0, k_w1, k_a1, k_out = jax.random.split(key, 7)

    # Deterministic parameter init mirroring the module's __init__ shapes.
    # layer_in_dim = [IN_DIM] + DEPTH * [N_FUNCS]
    qz_mean = float(np.log(1.0 - DROPRATE_INIT) - np.log(DROPRATE_INIT))  # = 0.0
    w0 = INIT_STDDEV * jax.random.normal(k_w0, (IN_DIM, OUT_DIM), jnp.float32)
    a0 = qz_mean + 0.01 * jax.random.normal(k_a0, (IN_DIM, OUT_DIM), jnp.float32)
    w1 = INIT_STDDEV * jax.random.normal(k_w1, (N_FUNCS, OUT_DIM), jnp.float32)
    a1 = qz_mean + 0.01 * jax.random.normal(k_a1, (N_FUNCS, OUT_DIM), jnp.float32)
    w_out = 2.0 * jax.random.uniform(k_out, (N_FUNCS, 1), dtype=jnp.float32)

    # batch=256 -> single grid step; batch=100 -> exercises the pad/remainder path.
    for batch, kx in ((256, k_x), (100, k_x2)):
        x = jax.random.normal(kx, (batch, IN_DIM), jnp.float32)
        y = jax.block_until_ready(
            symbolic_net_l0_forward(x, w0, a0, w1, a1, w_out))
        assert y.shape == (batch, 1)
        y_ref = _reference_forward(x, w0, a0, w1, a1, w_out)
        np.testing.assert_allclose(np.asarray(y), np.asarray(y_ref),
                                   rtol=1e-5, atol=1e-5)

    print("KERNEL_OK")
</pallas_src>

<mosaic_0001>
module attributes {stable_mosaic.version = 11 : i64} {
  func.func @_symbolic_net_kernel(%arg0: i32, %arg1: memref<2x256xf32, #tpu.memory_space<vmem>>, %arg2: memref<6x15xf32, #tpu.memory_space<vmem>>, %arg3: memref<1x256xf32, #tpu.memory_space<vmem>>) attributes {dimension_semantics = [#tpu.dimension_semantics<parallel>], iteration_bounds = array<i64: 1>, scalar_prefetch = 0 : i64, scratch_operands = 0 : i64, tpu.core_type = #tpu.core_type<tc>, window_params = [{transform_indices = @transform_0, window_bounds = array<i64: 2, 256>}, {pipeline_mode = #tpu.pipeline_mode<synchronous>, transform_indices = @transform_1, window_bounds = array<i64: 6, 15>}, {transform_indices = @transform_2, window_bounds = array<i64: 1, 256>}]} {
    %c0 = arith.constant 0 : index
    %c0_0 = arith.constant 0 : index
    %0 = vector.load %arg2[%c0, %c0_0] : memref<6x15xf32, #tpu.memory_space<vmem>>, vector<6x15xf32>
    %c0_1 = arith.constant 0 : index
    %c0_2 = arith.constant 0 : index
    %1 = vector.load %arg1[%c0_1, %c0_2] : memref<2x256xf32, #tpu.memory_space<vmem>>, vector<2x256xf32>
    %2 = vector.extract_strided_slice %1 {offsets = [0, 0], sizes = [1, 256], strides = [1, 1]} : vector<2x256xf32> to vector<1x256xf32>
    %3 = vector.extract_strided_slice %1 {offsets = [1, 0], sizes = [1, 256], strides = [1, 1]} : vector<2x256xf32> to vector<1x256xf32>
    %4 = vector.extract_strided_slice %0 {offsets = [0, 0], sizes = [6, 2], strides = [1, 1]} : vector<6x15xf32> to vector<6x2xf32>
    %5 = vector.extract_strided_slice %0 {offsets = [0, 2], sizes = [6, 2], strides = [1, 1]} : vector<6x15xf32> to vector<6x2xf32>
    %6 = arith.negf %5 : vector<6x2xf32>
    %7 = math.exp %6 : vector<6x2xf32>
    %cst = arith.constant 1.000000e+00 : f32
    %8 = vector.broadcast %cst : f32 to vector<6x2xf32>
    %9 = arith.addf %8, %7 : vector<6x2xf32>
    %10 = arith.divf %8, %9 : vector<6x2xf32>
    %cst_3 = arith.constant 1.200000e+00 : f32
    %11 = vector.broadcast %cst_3 : f32 to vector<6x2xf32>
    %12 = arith.mulf %10, %11 : vector<6x2xf32>
    %cst_4 = arith.constant -1.000000e-01 : f32
    %13 = vector.broadcast %cst_4 : f32 to vector<6x2xf32>
    %14 = arith.addf %12, %13 : vector<6x2xf32>
    %cst_5 = arith.constant 0.000000e+00 : f32
    %cst_6 = arith.constant 1.000000e+00 : f32
    %15 = vector.broadcast %cst_5 : f32 to vector<6x2xf32>
    %16 = arith.maximumf %15, %14 : vector<6x2xf32>
    %17 = vector.broadcast %cst_6 : f32 to vector<6x2xf32>
    %18 = arith.minimumf %17, %16 : vector<6x2xf32>
    %19 = arith.mulf %4, %18 : vector<6x2xf32>
    %20 = vector.extract_strided_slice %19 {offsets = [0, 0], sizes = [6, 1], strides = [1, 1]} : vector<6x2xf32> to vector<6x1xf32>
    %21 = vector.broadcast %20 : vector<6x1xf32> to vector<6x256xf32>
    %22 = vector.broadcast %2 : vector<1x256xf32> to vector<6x256xf32>
    %23 = arith.mulf %21, %22 : vector<6x256xf32>
    %24 = vector.extract_strided_slice %19 {offsets = [0, 1], sizes = [6, 1], strides = [1, 1]} : vector<6x2xf32> to vector<6x1xf32>
    %25 = vector.broadcast %24 : vector<6x1xf32> to vector<6x256xf32>
    %26 = vector.broadcast %3 : vector<1x256xf32> to vector<6x256xf32>
    %27 = arith.mulf %25, %26 : vector<6x256xf32>
    %28 = arith.addf %23, %27 : vector<6x256xf32>
    %29 = vector.extract_strided_slice %28 {offsets = [0, 0], sizes = [1, 256], strides = [1, 1]} : vector<6x256xf32> to vector<1x256xf32>
    %30 = vector.extract_strided_slice %28 {offsets = [1, 0], sizes = [1, 256], strides = [1, 1]} : vector<6x256xf32> to vector<1x256xf32>
    %31 = vector.extract_strided_slice %28 {offsets = [1, 0], sizes = [1, 256], strides = [1, 1]} : vector<6x256xf32> to vector<1x256xf32>
    %32 = arith.mulf %30, %31 : vector<1x256xf32>
    %33 = vector.extract_strided_slice %28 {offsets = [2, 0], sizes = [1, 256], strides = [1, 1]} : vector<6x256xf32> to vector<1x256xf32>
    %34 = math.sin %33 : vector<1x256xf32>
    %35 = vector.extract_strided_slice %28 {offsets = [3, 0], sizes = [1, 256], strides = [1, 1]} : vector<6x256xf32> to vector<1x256xf32>
    %36 = math.cos %35 : vector<1x256xf32>
    %37 = vector.extract_strided_slice %28 {offsets = [4, 0], sizes = [1, 256], strides = [1, 1]} : vector<6x256xf32> to vector<1x256xf32>
    %38 = vector.extract_strided_slice %28 {offsets = [5, 0], sizes = [1, 256], strides = [1, 1]} : vector<6x256xf32> to vector<1x256xf32>
    %39 = arith.mulf %37, %38 : vector<1x256xf32>
    %40 = vector.extract_strided_slice %0 {offsets = [0, 4], sizes = [6, 5], strides = [1, 1]} : vector<6x15xf32> to vector<6x5xf32>
    %41 = vector.extract_strided_slice %0 {offsets = [0, 9], sizes = [6, 5], strides = [1, 1]} : vector<6x15xf32> to vector<6x5xf32>
    %42 = arith.negf %41 : vector<6x5xf32>
    %43 = math.exp %42 : vector<6x5xf32>
    %cst_7 = arith.constant 1.000000e+00 : f32
    %44 = vector.broadcast %cst_7 : f32 to vector<6x5xf32>
    %45 = arith.addf %44, %43 : vector<6x5xf32>
    %46 = arith.divf %44, %45 : vector<6x5xf32>
    %cst_8 = arith.constant 1.200000e+00 : f32
    %47 = vector.broadcast %cst_8 : f32 to vector<6x5xf32>
    %48 = arith.mulf %46, %47 : vector<6x5xf32>
    %cst_9 = arith.constant -1.000000e-01 : f32
    %49 = vector.broadcast %cst_9 : f32 to vector<6x5xf32>
    %50 = arith.addf %48, %49 : vector<6x5xf32>
    %cst_10 = arith.constant 0.000000e+00 : f32
    %cst_11 = arith.constant 1.000000e+00 : f32
    %51 = vector.broadcast %cst_10 : f32 to vector<6x5xf32>
    %52 = arith.maximumf %51, %50 : vector<6x5xf32>
    %53 = vector.broadcast %cst_11 : f32 to vector<6x5xf32>
    %54 = arith.minimumf %53, %52 : vector<6x5xf32>
    %55 = arith.mulf %40, %54 : vector<6x5xf32>
    %56 = vector.extract_strided_slice %55 {offsets = [0, 0], sizes = [6, 1], strides = [1, 1]} : vector<6x5xf32> to vector<6x1xf32>
    %57 = vector.broadcast %56 : vector<6x1xf32> to vector<6x256xf32>
    %58 = vector.broadcast %29 : vector<1x256xf32> to vector<6x256xf32>
    %59 = arith.mulf %57, %58 : vector<6x256xf32>
    %60 = vector.extract_strided_slice %55 {offsets = [0, 1], sizes = [6, 1], strides = [1, 1]} : vector<6x5xf32> to vector<6x1xf32>
    %61 = vector.broadcast %60 : vector<6x1xf32> to vector<6x256xf32>
    %62 = vector.broadcast %32 : vector<1x256xf32> to vector<6x256xf32>
    %63 = arith.mulf %61, %62 : vector<6x256xf32>
    %64 = arith.addf %59, %63 : vector<6x256xf32>
    %65 = vector.extract_strided_slice %55 {offsets = [0, 2], sizes = [6, 1], strides = [1, 1]} : vector<6x5xf32> to vector<6x1xf32>
    %66 = vector.broadcast %65 : vector<6x1xf32> to vector<6x256xf32>
    %67 = vector.broadcast %34 : vector<1x256xf32> to vector<6x256xf32>
    %68 = arith.mulf %66, %67 : vector<6x256xf32>
    %69 = arith.addf %64, %68 : vector<6x256xf32>
    %70 = vector.extract_strided_slice %55 {offsets = [0, 3], sizes = [6, 1], strides = [1, 1]} : vector<6x5xf32> to vector<6x1xf32>
    %71 = vector.broadcast %70 : vector<6x1xf32> to vector<6x256xf32>
    %72 = vector.broadcast %36 : vector<1x256xf32> to vector<6x256xf32>
    %73 = arith.mulf %71, %72 : vector<6x256xf32>
    %74 = arith.addf %69, %73 : vector<6x256xf32>
    %75 = vector.extract_strided_slice %55 {offsets = [0, 4], sizes = [6, 1], strides = [1, 1]} : vector<6x5xf32> to vector<6x1xf32>
    %76 = vector.broadcast %75 : vector<6x1xf32> to vector<6x256xf32>
    %77 = vector.broadcast %39 : vector<1x256xf32> to vector<6x256xf32>
    %78 = arith.mulf %76, %77 : vector<6x256xf32>
    %79 = arith.addf %74, %78 : vector<6x256xf32>
    %80 = vector.extract_strided_slice %79 {offsets = [0, 0], sizes = [1, 256], strides = [1, 1]} : vector<6x256xf32> to vector<1x256xf32>
    %81 = vector.extract_strided_slice %79 {offsets = [1, 0], sizes = [1, 256], strides = [1, 1]} : vector<6x256xf32> to vector<1x256xf32>
    %82 = vector.extract_strided_slice %79 {offsets = [1, 0], sizes = [1, 256], strides = [1, 1]} : vector<6x256xf32> to vector<1x256xf32>
    %83 = arith.mulf %81, %82 : vector<1x256xf32>
    %84 = vector.extract_strided_slice %79 {offsets = [2, 0], sizes = [1, 256], strides = [1, 1]} : vector<6x256xf32> to vector<1x256xf32>
    %85 = math.sin %84 : vector<1x256xf32>
    %86 = vector.extract_strided_slice %79 {offsets = [3, 0], sizes = [1, 256], strides = [1, 1]} : vector<6x256xf32> to vector<1x256xf32>
    %87 = math.cos %86 : vector<1x256xf32>
    %88 = vector.extract_strided_slice %79 {offsets = [4, 0], sizes = [1, 256], strides = [1, 1]} : vector<6x256xf32> to vector<1x256xf32>
    %89 = vector.extract_strided_slice %79 {offsets = [5, 0], sizes = [1, 256], strides = [1, 1]} : vector<6x256xf32> to vector<1x256xf32>
    %90 = arith.mulf %88, %89 : vector<1x256xf32>
    %91 = vector.extract_strided_slice %0 {offsets = [0, 14], sizes = [1, 1], strides = [1, 1]} : vector<6x15xf32> to vector<1x1xf32>
    %92 = vector.broadcast %91 : vector<1x1xf32> to vector<1x256xf32>
    %93 = arith.mulf %92, %80 : vector<1x256xf32>
    %94 = vector.extract_strided_slice %0 {offsets = [1, 14], sizes = [1, 1], strides = [1, 1]} : vector<6x15xf32> to vector<1x1xf32>
    %95 = vector.broadcast %94 : vector<1x1xf32> to vector<1x256xf32>
    %96 = arith.mulf %95, %83 : vector<1x256xf32>
    %97 = arith.addf %93, %96 : vector<1x256xf32>
    %98 = vector.extract_strided_slice %0 {offsets = [2, 14], sizes = [1, 1], strides = [1, 1]} : vector<6x15xf32> to vector<1x1xf32>
    %99 = vector.broadcast %98 : vector<1x1xf32> to vector<1x256xf32>
    %100 = arith.mulf %99, %85 : vector<1x256xf32>
    %101 = arith.addf %97, %100 : vector<1x256xf32>
    %102 = vector.extract_strided_slice %0 {offsets = [3, 14], sizes = [1, 1], strides = [1, 1]} : vector<6x15xf32> to vector<1x1xf32>
    %103 = vector.broadcast %102 : vector<1x1xf32> to vector<1x256xf32>
    %104 = arith.mulf %103, %87 : vector<1x256xf32>
    %105 = arith.addf %101, %104 : vector<1x256xf32>
    %106 = vector.extract_strided_slice %0 {offsets = [4, 14], sizes = [1, 1], strides = [1, 1]} : vector<6x15xf32> to vector<1x1xf32>
    %107 = vector.broadcast %106 : vector<1x1xf32> to vector<1x256xf32>
    %108 = arith.mulf %107, %90 : vector<1x256xf32>
    %109 = arith.addf %105, %108 : vector<1x256xf32>
    %c0_12 = arith.constant 0 : index
    %c0_13 = arith.constant 0 : index
    %110 = vector.load %arg3[%c0_12, %c0_13] : memref<1x256xf32, #tpu.memory_space<vmem>>, vector<1x256xf32>
    tpu.vector_store %arg3[%c0_12, %c0_13], %109 {strides = array<i32>} : memref<1x256xf32, #tpu.memory_space<vmem>>, vector<1x256xf32>,
    return
  }
  func.func @transform_0(%arg0: i32) -> (i32, i32) {
    %c0_i32 = arith.constant 0 : i32
    %c0_i32_0 = arith.constant 0 : i32
    return %c0_i32, %arg0 : i32, i32
  }
  func.func @transform_1(%arg0: i32) -> (i32, i32) {
    %c0_i32 = arith.constant 0 : i32
    %c0_i32_0 = arith.constant 0 : i32
    %c0_i32_1 = arith.constant 0 : i32
    return %c0_i32, %c0_i32_0 : i32, i32
  }
  func.func @transform_2(%arg0: i32) -> (i32, i32) {
    %c0_i32 = arith.constant 0 : i32
    %c0_i32_0 = arith.constant 0 : i32
    return %c0_i32, %arg0 : i32, i32
  }
}

</mosaic_0001>

<bundles_post_ra>
// kernel: symbolic_net_l0_forward.1
= control target key start
LH: loop header
LB: loop body
LE: loop exit
PB: predicated region body
PF: predicated region fallthrough
CT: control target
= control target key end

     0   :  { %s1520_s0 = inlined_call_operand.vmem [shape: f32[2,256], index: 0, kind: input, shape index: {}]   ;;  %s1521_s1 = inlined_call_operand.vmem [shape: f32[6,15], index: 1, kind: input, shape index: {}]   ;;  %s1522_s2 = inlined_call_operand.hbm [shape: f32[1,256], index: 2, kind: output, shape index: {}]  }
   0x1   :  { %v1252_v0 = vld [vmem:[%s1521_s1] sm:$0x3f] }
   0x2   :  { %7 = vsyncpa [#allocation3], 0  ;;  %v1096_v1 = vmul.f32 -1.442695, %v1252_v0  ;;  %v1216_v4 = vmov 1   ;;  %v1217_v5 = vmov 0   ;;  %v35_v15 = vlaneseq }
   0x3   :  { %1164 = vset.pattern.permute.xlu1 %v1216_v4  ;;  %1163 = vset.pattern.permute.xlu0 %v1217_v5  ;;  %s1218_s11 = smov 126   ;;  %s1219_s1 = smov 123   ;;  %v1220_v13 = vmov 4   ;;  %v1221_v14 = vmov 5   ;;  %v13_v21 = vld [vmem:[%s1520_s0] sm:$0xf] }
   0x4   :  { %1172 = vpow2.f32 %v1096_v1  ;;  %v1257_v16 = vshrl.u32 %v35_v15, 7  ;;  %v1222_v47 = vmov 6   ;;  %v1223_v48 = vmov 8   ;;  %s1233_s0 = smov [#allocation2]  }
   0x5   :  { %v1224_v56 = vmov 7   ;;  %v1225_v59 = vmov 14   ;;  %v1226_v62 = vmov 683565275   ;;  %v1228_v4 = vmov 2131351028  }
   0x6   :  { %v1260_v17 = vsub.s32 1, %v1257_v16  ;;  %v1263_v18 = vsub.s32 3, %v1257_v16  ;;  %v1266_v19 = vsub.s32 0, %v1257_v16  ;;  %v1269_v20 = vsub.s32 2, %v1257_v16  ;;  %s1088_s14 = sshll.u32 %s1233_s0, 4  ;;  %s1089_s14 = int_to_ptr.vmem [resolvable:$true] %s1088_s14 }
   0x7   :  { %s1192_s15 = scalar_lea.vmem %s1089_s14, 32  ;;  %p1197_p1 = scmp.lt.s32.totalorder %s1089_s14, %s1089_s14 }
   0x8   :  { %v62_v22 = vrot.slane %v13_v21, %v1260_v17  ;;  %v66_v23 = vrot.slane %v13_v21, %v1263_v18  ;;  %v38_v24 = vrot.slane %v13_v21, %v1266_v19  ;;  %v42_v25 = vrot.slane %v13_v21, %v1269_v20  ;;  %p1193_p0 = scmp.ne.s32.totalorder %s1089_s14, %s1192_s15  ;;  %p1198_p2 = scmp.lt.s32.totalorder %s1192_s15, %s1192_s15 }
   0x9   :  { %v1231_v21 = vmov 1326507024  }
   0xa   :  { %v72_v26 = vrot.slane %v62_v22, %v1260_v17  ;;  %v76_v27 = vrot.slane %v66_v23, %v1260_v17  ;;  %v48_v28 = vrot.slane %v38_v24, %v1266_v19  ;;  %v52_v29 = vrot.slane %v42_v25, %v1266_v19  ;;  %p1199_p3 = por %p1198_p2, %p1197_p1 }
   0xc   :  { %p1200_p4 = pnand %p1199_p3, %p1193_p0 }
   0xe   :  { %v1173_v2 = vpop.eup %1172 }
   0xf   :  { %v17_v3 = vadd.f32 1.0, %v1173_v2  ;;  %v1227_v2 = vmov 2475754826  }
  0x11   :  { %1174 = vrcp.f32 %v17_v3 }
  0x1b   :  { %v1175_v6 = vpop.eup %1174 }
  0x1c   :  { %v20_v7 = vmul.f32 1.2, %v1175_v6  ;;  %v1229_v6 = vmov 2102212464  }
  0x1e   :  { %v21_v8 = vadd.f32 -0.1, %v20_v7 }
  0x20   :  { %v22_v9 = vmax.f32 %v21_v8, 0.0  ;;  %v1230_v8 = vmov 920167782  }
  0x22   :  { %v23_v10 = vmin.f32 %v22_v9, 1.0 }
  0x24   :  { %25 = vrot.lane.b32.xlu0 %v23_v10, %s1218_s11 }
  0x96   :  { %v26_v11 = vpop.permute.xlu0 %25 }
  0x97   :  { %v28_v12 = vmul.f32 %v26_v11, %v1252_v0 }
  0x99   :  { %56 = vperm.xlu1 %1164, %v28_v12   ;;  %31 = vperm.xlu0 %1163, %v28_v12  }
  0x9d   :  { %505 = vrot.lane.b32.xlu1 %v23_v10, %s1219_s1  ;;  %1166 = vset.pattern.permute.xlu0 %v1221_v14 }
  0x9e   :  { %1165 = vset.pattern.permute.xlu1 %v1220_v13 }
 0x118   :  { %v57_v30 = vpop.permute.xlu1 %56  ;;  %v32_v31 = vpop.permute.xlu0 %31 }
 0x119   :  { %v77_v32 = vmul.f32 %v72_v26, %v57_v30  ;;  %v78_v33 = vmul.f32 %v76_v27, %v57_v30  ;;  %v53_v34 = vmul.f32 %v48_v28, %v32_v31  ;;  %v54_v35 = vmul.f32 %v52_v29, %v32_v31 }
 0x11b   :  { %v1282_v36 = vadd.f32 %v77_v32, %v53_v34  ;;  %v1284_v38 = vadd.f32 %v78_v33, %v54_v35 }
 0x11c   :  { %v506_v37 = vpop.permute.xlu1 %505 }
 0x11d   :  { %v508_v39 = vmul.f32 %v506_v37, %v1252_v0  ;;  %v83_v40 = vand.u32 2147483647, %v1282_v36  ;;  %v86_v41 = vand.u32 2139095040, %v1282_v36  ;;  %v187_v43 = vand.u32 2147483647, %v1284_v38 }
 0x11e   :  { %v190_v44 = vand.u32 2139095040, %v1284_v38  ;;  %vm85_vm14 = vcmp.lt.s32.totalorder %v1282_v36, 0  ;;  %vm189_vm15 = vcmp.lt.s32.totalorder %v1284_v38, 0 }
 0x11f   :  { %511 = vperm.xlu1 %1165, %v508_v39   ;;  %525 = vperm.xlu0 %1166, %v508_v39   ;;  %v87_v42 = vshrl.u32 %v86_v41, 23  ;;  %v90_v46 = vand.u32 8388607, %v83_v40  ;;  %v194_v52 = vand.u32 8388607, %v187_v43 }
 0x120   :  { %v191_v49 = vshrl.u32 %v190_v44, 23 }
 0x121   :  { %v1097_v45 = vadd.s32 4294967169, %v87_v42  ;;  %v91_v53 = vor.u32 8388608, %v90_v46  ;;  %v195_v60 = vor.u32 8388608, %v194_v52 }
 0x122   :  { %v1101_v51 = vadd.s32 4294967169, %v191_v49 }
 0x123   :  { %1167 = vset.pattern.permute.xlu1 %v1222_v47  ;;  %1169 = vset.pattern.permute.xlu0 %v1223_v48  ;;  %v93_v50 = vadd.s32 1, %v1097_v45  ;;  %v1296_v1 = vshll.u32 %v91_v53, 8  ;;  %v235_v42 = vshll.u32 %v195_v60, 8 }
 0x124   :  { %541 = vperm.xlu1 %1167, %v508_v39   ;;  %573 = vperm.xlu0 %1169, %v508_v39   ;;  %v197_v55 = vadd.s32 1, %v1101_v51 }
 0x125   :  { %vm94_vm0 = vcmp.gt.s32.totalorder %v93_v50, 0 }
 0x126   :  { %v95_v54 = vsel %vm94_vm0, %v93_v50, 0  ;;  %vm198_vm1 = vcmp.gt.s32.totalorder %v197_v55, 0  ;;  %vm84_vm0 = vcmp.le.f32.partialorder %v83_v40, 0.7853982 }
 0x127   :  { %v96_v57 = vshrl.u32 %v95_v54, 5  ;;  %v97_v58 = vand.u32 31, %v95_v54  ;;  %v199_v26 = vsel %vm198_vm1, %v197_v55, 0  ;;  %vm188_vm1 = vcmp.le.f32.partialorder %v187_v43, 0.7853982 }
 0x128   :  { %1168 = vset.pattern.permute.xlu1 %v1224_v56  ;;  %1171 = vset.pattern.permute.xlu0 %v1225_v59  ;;  %v201_v29 = vand.u32 31, %v199_v26  ;;  %v200_v47 = vshrl.u32 %v199_v26, 5 }
 0x129   :  { %557 = vperm.xlu1 %1168, %v508_v39   ;;  %v98_v61 = vsub.s32 32, %v97_v58  ;;  %v100_v63 = vshll.u32 %v1226_v62, %v97_v58  ;;  %v103_v3 = vshll.u32 %v1227_v2, %v97_v58  ;;  %v106_v5 = vshll.u32 %v1228_v4, %v97_v58 }
 0x12a   :  { %v109_v7 = vshll.u32 %v1229_v6, %v97_v58  ;;  %v112_v9 = vshll.u32 %v1230_v8, %v97_v58  ;;  %vm115_vm2 = vcmp.lt.s32.totalorder %v96_v57, 1  ;;  %vm117_vm3 = vcmp.lt.s32.totalorder %v96_v57, 3 }
 0x12b   :  { %v101_v10 = vshrl.u32 %v1227_v2, %v98_v61  ;;  %v104_v11 = vshrl.u32 %v1228_v4, %v98_v61  ;;  %v107_v12 = vshrl.u32 %v1229_v6, %v98_v61  ;;  %v99_v13 = vshrl.u32 %v1226_v62, %v98_v61 }
 0x12c   :  { %v110_v14 = vshrl.u32 %v1230_v8, %v98_v61  ;;  %v113_v22 = vshrl.u32 %v1231_v21, %v98_v61  ;;  %vm118_vm4 = vcmp.lt.s32.totalorder %v96_v57, 4  ;;  %v202_v37 = vsub.s32 32, %v201_v29 }
 0x12d   :  { %1170 = vset.pattern.permute.xlu1 %v1225_v59  ;;  %v102_v23 = vor.u32 %v101_v10, %v100_v63  ;;  %v105_v24 = vor.u32 %v104_v11, %v103_v3  ;;  %v108_v25 = vor.u32 %v107_v12, %v106_v5  ;;  %vm116_vm5 = vcmp.lt.s32.totalorder %v96_v57, 2 }
 0x12e   :  { %1014 = vperm.xlu1 %1170, %v1252_v0   ;;  %v111_v27 = vor.u32 %v110_v14, %v109_v7  ;;  %v114_v28 = vor.u32 %v113_v22, %v112_v9  ;;  %v204_v52 = vshll.u32 %v1226_v62, %v201_v29  ;;  %v205_v53 = vshrl.u32 %v1227_v2, %v202_v37 }
 0x12f   :  { %v119_v30 = vsel %vm115_vm2, %v99_v13, %v102_v23  ;;  %v120_v31 = vsel %vm118_vm4, %v108_v25, 2102212464  ;;  %v123_v32 = vsel %vm115_vm2, %v102_v23, %v105_v24  ;;  %v127_v33 = vsel %vm115_vm2, %v105_v24, %v108_v25 }
 0x130   :  { %v121_v34 = vsel %vm117_vm3, %v105_v24, %v120_v31  ;;  %v124_v35 = vsel %vm118_vm4, %v111_v27, 920167782  ;;  %v128_v0 = vsel %vm118_vm4, %v114_v28, 1326507024  ;;  %v207_v54 = vshll.u32 %v1227_v2, %v201_v29 }
 0x131   :  { %v125_v39 = vsel %vm117_vm3, %v108_v25, %v124_v35  ;;  %v129_v41 = vsel %vm117_vm3, %v111_v27, %v128_v0  ;;  %v122_v44 = vsel %vm116_vm5, %v119_v30, %v121_v34  ;;  %v208_v55 = vshrl.u32 %v1228_v4, %v202_v37 }
 0x132   :  { %v126_v45 = vsel %vm116_vm5, %v123_v32, %v125_v39  ;;  %v130_v46 = vsel %vm116_vm5, %v127_v33, %v129_v41  ;;  %v210_v56 = vshll.u32 %v1228_v4, %v201_v29  ;;  %v211_v57 = vshrl.u32 %v1229_v6, %v202_v37 }
 0x133   :  { %v1317_v48 = vmul.u32.u64.low %v1296_v1, %v130_v46  ;;  %v1318_v49 = vmul.u32.u64.high %v1296_v1, %v130_v46, %v1317_v48  ;;  %v1321_v50 = vmul.u32.u64.low %v1296_v1, %v126_v45  ;;  %v1322_v51 = vmul.u32.u64.high %v1296_v1, %v126_v45, %v1321_v50 }
 0x134   :  { %v213_v58 = vshll.u32 %v1229_v6, %v201_v29  ;;  %v214_v59 = vshrl.u32 %v1230_v8, %v202_v37  ;;  %v206_v60 = vor.u32 %v205_v53, %v204_v52  ;;  %v209_v61 = vor.u32 %v208_v55, %v207_v54 }
 0x135   :  { %v216_v63 = vshll.u32 %v1230_v8, %v201_v29  ;;  %v217_v3 = vshrl.u32 %v1231_v21, %v202_v37  ;;  %v138_v5 = vmul.u32 %v1296_v1, %v122_v44  ;;  %vm140_vm6 = vc.u32 %v1318_v49, %v1321_v50 }
 0x136   :  { %v141_v7 = vadd.s32 1, %v1322_v51  ;;  %v212_v9 = vor.u32 %v211_v57, %v210_v56  ;;  %v203_v10 = vshrl.u32 %v1226_v62, %v202_v37  ;;  %v215_v11 = vor.u32 %v214_v59, %v213_v58 }
 0x137   :  { %v218_v12 = vor.u32 %v217_v3, %v216_v63  ;;  %vm219_vm7 = vcmp.lt.s32.totalorder %v200_v47, 1  ;;  %vm221_vm8 = vcmp.lt.s32.totalorder %v200_v47, 3  ;;  %vm222_vm9 = vcmp.lt.s32.totalorder %v200_v47, 4 }
 0x138   :  { %v142_v13 = vsel %vm140_vm6, %v141_v7, %v1322_v51  ;;  %v227_v14 = vsel %vm219_vm7, %v206_v60, %v209_v61  ;;  %v224_v23 = vsel %vm222_vm9, %v212_v9, 2102212464  ;;  %v228_v24 = vsel %vm222_vm9, %v215_v11, 920167782 }
 0x139   :  { %v143_v22 = vadd.s32 %v142_v13, %v138_v5  ;;  %v231_v1 = vsel %vm219_vm7, %v209_v61, %v212_v9  ;;  %vm220_vm10 = vcmp.lt.s32.totalorder %v200_v47, 2  ;;  %v223_v25 = vsel %vm219_vm7, %v203_v10, %v206_v60 }
 0x13a   :  { %v229_v26 = vsel %vm221_vm8, %v212_v9, %v228_v24  ;;  %v232_v27 = vsel %vm222_vm9, %v218_v12, 1326507024  ;;  %v225_v29 = vsel %vm221_vm8, %v209_v61, %v224_v23  ;;  %v139_v12 = vadd.s32 %v1321_v50, %v1318_v49 }
 0x13b   :  { %v144_v28 = vadd.s32 536870912, %v143_v22  ;;  %v230_v30 = vsel %vm220_vm10, %v227_v14, %v229_v26  ;;  %v233_v31 = vsel %vm221_vm8, %v215_v11, %v232_v27  ;;  %v226_v37 = vsel %vm220_vm10, %v223_v25, %v225_v29 }
 0x13c   :  { %v234_v32 = vsel %vm220_vm10, %v231_v1, %v233_v31  ;;  %v1341_v33 = vmul.u32.u64.low %v235_v42, %v230_v30  ;;  %v1342_v34 = vmul.u32.u64.high %v235_v42, %v230_v30, %v1341_v33  ;;  %v242_v44 = vmul.u32 %v235_v42, %v226_v37 }
 0x13d   :  { %v1344_v35 = vmul.u32.u64.low %v235_v42, %v234_v32  ;;  %v1345_v0 = vmul.u32.u64.high %v235_v42, %v234_v32, %v1344_v35  ;;  %v1347_v39 = vshrl.u32 %v144_v28, 30  ;;  %vm175_vm8 = vweird.f32 %v1282_v36 }
 0x13e   :  { %v245_v41 = vadd.s32 1, %v1342_v34  ;;  %vm279_vm9 = vweird.f32 %v1284_v38 }
 0x13f   :  { %vm244_vm11 = vc.u32 %v1345_v0, %v1341_v33  ;;  %v146_v46 = vshll.u32 %v1347_v39, 30  ;;  %v243_v23 = vadd.s32 %v1341_v33, %v1345_v0 }
 0x140   :  { %v246_v45 = vsel %vm244_vm11, %v245_v41, %v1342_v34 }
 0x141   :  { %v247_v47 = vadd.s32 %v246_v45, %v242_v44  ;;  %v147_v51 = vsub.s32 %v143_v22, %v146_v46  ;;  %v169_v46 = vsub.s32 4, %v1347_v39 }
 0x143   :  { %v248_v48 = vadd.s32 536870912, %v247_v47  ;;  %v149_v54 = vsub.s32 0, %v147_v51 }
 0x145   :  { %v249_v52 = vshrl.u32 %v248_v48, 30  ;;  %v1098_v57 = vmin.u32 %v149_v54, %v147_v51  ;;  %v170_v48 = vsel %vm85_vm14, %v169_v46, %v1347_v39 }
 0x147   :  { %v250_v53 = vshll.u32 %v249_v52, 30  ;;  %v151_v59 = vclz %v1098_v57 }
 0x149   :  { %v251_v55 = vsub.s32 %v247_v47, %v250_v53  ;;  %v1099_v61 = vadd.s32 4294967294, %v151_v59  ;;  %v273_v47 = vsub.s32 4, %v249_v52  ;;  %v172_v53 = vsel %vm84_vm0, 0, %v170_v48 }
 0x14b   :  { %v253_v56 = vsub.s32 0, %v251_v55  ;;  %vm1100_vm12 = vcmp.lt.s32.totalorder %v1099_v61, 0 }
 0x14c   :  { %v154_v63 = vsel %vm1100_vm12, 0, %v1099_v61 }
 0x14d   :  { %v1102_v58 = vmin.u32 %v253_v56, %v251_v55  ;;  %v159_v5 = vsub.s32 4294967266, %v154_v63  ;;  %v155_v10 = vsub.s32 32, %v154_v63  ;;  %v156_v1 = vshll.u32 %v147_v51, %v154_v63 }
 0x14e   :  { %v274_v51 = vsel %vm189_vm15, %v273_v47, %v249_v52 }
 0x14f   :  { %v255_v60 = vclz %v1102_v58  ;;  %v160_v9 = vadd.s32 127, %v159_v5  ;;  %v157_v22 = vshrl.u32 %v139_v12, %v155_v10  ;;  %v276_v40 = vsel %vm188_vm1, 0, %v274_v51 }
 0x150   :  { %v280_v57 = vadd.s32 3, %v276_v40  ;;  %v384_v5 = vand.u32 3, %v172_v53  ;;  %v487_v39 = vand.u32 3, %v276_v40  ;;  %v82_v12 = vmul.f32 %v1284_v38, %v1284_v38 }
 0x151   :  { %v1103_v42 = vadd.s32 4294967294, %v255_v60  ;;  %v161_v13 = vshll.u32 %v160_v9, 23  ;;  %v158_v27 = vor.u32 %v157_v22, %v156_v1 }
 0x152   :  { %v281_v60 = vand.u32 3, %v280_v57  ;;  %vm386_vm10 = vcmp.eq.s32.totalorder %v384_v5, 0  ;;  %vm389_vm11 = vcmp.eq.s32.totalorder %v384_v5, 2  ;;  %vm489_vm12 = vcmp.eq.s32.totalorder %v487_v39, 0 }
 0x153   :  { %vm1104_vm13 = vcmp.lt.s32.totalorder %v1103_v42, 0  ;;  %v162_v25 = vor.u32 4788187, %v161_v13  ;;  %v165_v32 = vcvt.s32.f32 %v158_v27  ;;  %v521_v27 = vrot.slane %v1284_v38, %v1266_v19 }
 0x154   :  { %v258_v3 = vsel %vm1104_vm13, 0, %v1103_v42  ;;  %vm283_vm4 = vcmp.eq.s32.totalorder %v281_v60, 0  ;;  %vm286_vm5 = vcmp.eq.s32.totalorder %v281_v60, 2  ;;  %vm282_vm7 = vcmp.lt.s32.totalorder %v281_v60, 2 }
 0x155   :  { %v263_v7 = vsub.s32 4294967266, %v258_v3  ;;  %v259_v14 = vsub.s32 32, %v258_v3  ;;  %v260_v28 = vshll.u32 %v251_v55, %v258_v3  ;;  %v163_v30 = vand.u32 2147483647, %v162_v25 }
 0x156   :  { %v176_v55 = vadd.s32 3, %v172_v53  ;;  %vm492_vm13 = vcmp.eq.s32.totalorder %v487_v39, 2 }
 0x157   :  { %v264_v11 = vadd.s32 127, %v263_v7  ;;  %v261_v26 = vshrl.u32 %v243_v23, %v259_v14  ;;  %v166_v35 = vmul.f32 %v165_v32, %v163_v30  ;;  %v500_v32 = vrot.slane %v1284_v38, 1 }
 0x158   :  { %v177_v59 = vand.u32 3, %v176_v55 }
 0x159   :  { %v265_v24 = vshll.u32 %v264_v11, 23  ;;  %v262_v31 = vor.u32 %v261_v26, %v260_v28  ;;  %v167_v49 = vxor.u32 2147483648, %v166_v35  ;;  %v81_v11 = vmul.f32 %v1282_v36, %v1282_v36 }
 0x15a   :  { %vm179_vm2 = vcmp.eq.s32.totalorder %v177_v59, 0  ;;  %vm182_vm3 = vcmp.eq.s32.totalorder %v177_v59, 2  ;;  %vm178_vm6 = vcmp.lt.s32.totalorder %v177_v59, 2  ;;  %v517_v26 = vrot.slane %v1282_v36, %v1266_v19 }
 0x15b   :  { %v266_v29 = vor.u32 4788187, %v265_v24  ;;  %v269_v37 = vcvt.s32.f32 %v262_v31  ;;  %v168_v44 = vsel %vm85_vm14, %v167_v49, %v166_v35  ;;  %v499_v31 = vrot.slane %v1282_v36, 1 }
 0x15c   :  { %v171_v0 = vsel %vm84_vm0, %v1282_v36, %v168_v44  ;;  %vm385_vm14 = vcmp.lt.s32.totalorder %v384_v5, 2  ;;  %v535_v35 = vrot.slane %v82_v12, %v1260_v17  ;;  %v504_v48 = vmul.f32 %v500_v32, %v1284_v38 }
 0x15d   :  { %v267_v34 = vand.u32 2147483647, %v266_v29  ;;  %1176 = vcosq.f32 %v171_v0  ;;  %v503_v47 = vmul.f32 %v499_v31, %v1282_v36 }
 0x15e   :  { %1178 = vsinq.f32 %v171_v0 }
 0x15f   :  { %v270_v41 = vmul.f32 %v269_v37, %v267_v34  ;;  %v531_v34 = vrot.slane %v81_v11, %v1260_v17 }
 0x161   :  { %v271_v50 = vxor.u32 2147483648, %v270_v41 }
 0x163   :  { %v272_v33 = vsel %vm189_vm15, %v271_v50, %v270_v41  ;;  %vm488_vm15 = vcmp.lt.s32.totalorder %v487_v39, 2  ;;  %v578_v50 = vsub.s32 4, %v1257_v16 }
 0x164   :  { %v275_v45 = vsel %vm188_vm1, %v1284_v38, %v272_v33 }
 0x165   :  { %1180 = vcosq.f32 %v275_v45  ;;  %v579_v57 = vrot.slane %v503_v47, %v578_v50 }
 0x166   :  { %1182 = vsinq.f32 %v275_v45 }
 0x167   :  { %v1177_v54 = vpop.eup %1176 }
 0x168   :  { %v1179_v56 = vpop.eup %1178  ;;  %v183_v42 = vxor.u32 2147483648, %v1177_v54 }
 0x169   :  { %v180_v61 = vxor.u32 2147483648, %v1179_v56 }
 0x16a   :  { %v184_v7 = vsel %vm182_vm3, %v183_v42, %v1179_v56  ;;  %v391_v24 = vsel %vm389_vm11, %v183_v42, %v1179_v56 }
 0x16b   :  { %v181_v52 = vsel %vm179_vm2, %v1177_v54, %v180_v61  ;;  %v388_v23 = vsel %vm386_vm10, %v1177_v54, %v180_v61 }
 0x16c   :  { %v185_v13 = vsel %vm178_vm6, %v181_v52, %v184_v7  ;;  %v392_v37 = vsel %vm385_vm14, %v388_v23, %v391_v24 }
 0x16d   :  { %v186_v28 = vsel %vm175_vm8, nan, %v185_v13  ;;  %v393_v17 = vsel %vm175_vm8, nan, %v392_v37 }
 0x16e   :  { %v547_v19 = vrot.slane %v186_v28, %v1269_v20  ;;  %v563_v55 = vrot.slane %v393_v17, %v1263_v18 }
 0x16f   :  { %v1181_v58 = vpop.eup %1180 }
 0x170   :  { %v1183_v43 = vpop.eup %1182  ;;  %v287_v3 = vxor.u32 2147483648, %v1181_v58 }
 0x171   :  { %v284_v63 = vxor.u32 2147483648, %v1183_v43 }
 0x172   :  { %v288_v10 = vsel %vm286_vm5, %v287_v3, %v1183_v43  ;;  %v494_v25 = vsel %vm492_vm13, %v287_v3, %v1183_v43 }
 0x173   :  { %v285_v9 = vsel %vm283_vm4, %v1181_v58, %v284_v63  ;;  %v491_v1 = vsel %vm489_vm12, %v1181_v58, %v284_v63  ;;  %v583_v58 = vrot.slane %v504_v48, %v578_v50 }
 0x174   :  { %v289_v14 = vsel %vm282_vm7, %v285_v9, %v288_v10  ;;  %v495_v41 = vsel %vm488_vm15, %v491_v1, %v494_v25 }
 0x175   :  { %v290_v29 = vsel %vm279_vm9, nan, %v289_v14  ;;  %v496_v51 = vsel %vm279_vm9, nan, %v495_v41 }
 0x176   :  { %v551_v49 = vrot.slane %v290_v29, %v1269_v20  ;;  %v567_v56 = vrot.slane %v496_v51, %v1263_v18 }
 0x19e   :  { %v512_v22 = vpop.permute.xlu1 %511  ;;  %v526_v30 = vpop.permute.xlu0 %525 }
 0x19f   :  { %v522_v44 = vmul.f32 %v517_v26, %v512_v22  ;;  %v523_v33 = vmul.f32 %v521_v27, %v512_v22  ;;  %v536_v0 = vmul.f32 %v531_v34, %v526_v30  ;;  %v537_v45 = vmul.f32 %v535_v35, %v526_v30 }
 0x1a1   :  { %v538_v20 = vadd.f32 %v536_v0, %v522_v44  ;;  %v539_v54 = vadd.f32 %v537_v45, %v523_v33 }
 0x1a3   :  { %v542_v46 = vpop.permute.xlu1 %541  ;;  %v574_v43 = vpop.permute.xlu0 %573 }
 0x1a4   :  { %v552_v53 = vmul.f32 %v547_v19, %v542_v46  ;;  %v553_v40 = vmul.f32 %v551_v49, %v542_v46  ;;  %v584_v63 = vmul.f32 %v579_v57, %v574_v43  ;;  %v585_v3 = vmul.f32 %v583_v58, %v574_v43 }
 0x1a6   :  { %v554_v60 = vadd.f32 %v552_v53, %v538_v20  ;;  %v555_v61 = vadd.f32 %v553_v40, %v539_v54 }
 0x1a8   :  { %v558_v59 = vpop.permute.xlu1 %557 }
 0x1a9   :  { %v568_v42 = vmul.f32 %v563_v55, %v558_v59  ;;  %v569_v36 = vmul.f32 %v567_v56, %v558_v59 }
 0x1ab   :  { %v570_v38 = vadd.f32 %v568_v42, %v554_v60  ;;  %v571_v5 = vadd.f32 %v569_v36, %v555_v61 }
 0x1ad   :  { %v1395_v39 = vadd.f32 %v584_v63, %v570_v38  ;;  %v1397_v52 = vadd.f32 %v585_v3, %v571_v5 }
 0x1af   :  { %v593_v7 = vand.u32 2139095040, %v1395_v39  ;;  %v697_v18 = vand.u32 2139095040, %v1397_v52  ;;  %v590_v9 = vand.u32 2147483647, %v1395_v39  ;;  %v694_v13 = vand.u32 2147483647, %v1397_v52 }
 0x1b0   :  { %vm592_vm14 = vcmp.lt.s32.totalorder %v1395_v39, 0 }
 0x1b1   :  { %v594_v10 = vshrl.u32 %v593_v7, 23  ;;  %v698_v11 = vshrl.u32 %v697_v18, 23  ;;  %v597_v12 = vand.u32 8388607, %v590_v9  ;;  %v701_v25 = vand.u32 8388607, %v694_v13 }
 0x1b2   :  { %vm591_vm15 = vcmp.le.f32.partialorder %v590_v9, 0.7853982 }
 0x1b3   :  { %v1113_v14 = vadd.s32 4294967169, %v594_v10  ;;  %v1117_v22 = vadd.s32 4294967169, %v698_v11  ;;  %v598_v1 = vor.u32 8388608, %v597_v12  ;;  %v702_v31 = vor.u32 8388608, %v701_v25 }
 0x1b5   :  { %v600_v23 = vadd.s32 1, %v1113_v14  ;;  %v704_v24 = vadd.s32 1, %v1117_v22  ;;  %v1407_v30 = vshll.u32 %v598_v1, 8 }
 0x1b7   :  { %vm601_vm0 = vcmp.gt.s32.totalorder %v600_v23, 0  ;;  %vm705_vm1 = vcmp.gt.s32.totalorder %v704_v24, 0 }
 0x1b8   :  { %v602_v26 = vsel %vm601_vm0, %v600_v23, 0  ;;  %v706_v27 = vsel %vm705_vm1, %v704_v24, 0  ;;  %vm696_vm0 = vcmp.lt.s32.totalorder %v1397_v52, 0  ;;  %vm695_vm1 = vcmp.le.f32.partialorder %v694_v13, 0.7853982 }
 0x1b9   :  { %v603_v28 = vshrl.u32 %v602_v26, 5  ;;  %v604_v29 = vand.u32 31, %v602_v26  ;;  %v1410_v35 = vshrl.u32 %v706_v27, 5  ;;  %v708_v37 = vand.u32 31, %v706_v27 }
 0x1ba   :  { %v742_v26 = vshll.u32 %v702_v31, 8 }
 0x1bb   :  { %v605_v32 = vsub.s32 32, %v604_v29  ;;  %v607_v34 = vshll.u32 %v1226_v62, %v604_v29  ;;  %v610_v41 = vshll.u32 %v1227_v2, %v604_v29  ;;  %v613_v19 = vshll.u32 %v1228_v4, %v604_v29 }
 0x1bc   :  { %v616_v49 = vshll.u32 %v1229_v6, %v604_v29  ;;  %v619_v50 = vshll.u32 %v1230_v8, %v604_v29  ;;  %vm622_vm2 = vcmp.lt.s32.totalorder %v603_v28, 1  ;;  %vm623_vm3 = vcmp.lt.s32.totalorder %v603_v28, 2 }
 0x1bd   :  { %v608_v44 = vshrl.u32 %v1227_v2, %v605_v32  ;;  %v611_v33 = vshrl.u32 %v1228_v4, %v605_v32  ;;  %v614_v0 = vshrl.u32 %v1229_v6, %v605_v32  ;;  %v606_v45 = vshrl.u32 %v1226_v62, %v605_v32 }
 0x1be   :  { %v617_v46 = vshrl.u32 %v1230_v8, %v605_v32  ;;  %v620_v47 = vshrl.u32 %v1231_v21, %v605_v32  ;;  %v709_v53 = vsub.s32 32, %v708_v37  ;;  %vm624_vm4 = vcmp.lt.s32.totalorder %v603_v28, 3 }
 0x1bf   :  { %v609_v48 = vor.u32 %v608_v44, %v607_v34  ;;  %v612_v17 = vor.u32 %v611_v33, %v610_v41  ;;  %v615_v51 = vor.u32 %v614_v0, %v613_v19  ;;  %vm625_vm5 = vcmp.lt.s32.totalorder %v603_v28, 4 }
 0x1c0   :  { %v618_v40 = vor.u32 %v617_v46, %v616_v49  ;;  %v621_v20 = vor.u32 %v620_v47, %v619_v50  ;;  %v711_v60 = vshll.u32 %v1226_v62, %v708_v37  ;;  %v712_v36 = vshrl.u32 %v1227_v2, %v709_v53 }
 0x1c1   :  { %v626_v54 = vsel %vm622_vm2, %v606_v45, %v609_v48  ;;  %v627_v55 = vsel %vm625_vm5, %v615_v51, 2102212464  ;;  %v630_v56 = vsel %vm622_vm2, %v609_v48, %v612_v17  ;;  %v634_v57 = vsel %vm622_vm2, %v612_v17, %v615_v51 }
 0x1c2   :  { %v628_v58 = vsel %vm624_vm4, %v612_v17, %v627_v55  ;;  %v631_v43 = vsel %vm625_vm5, %v618_v40, 920167782  ;;  %v635_v59 = vsel %vm625_vm5, %v621_v20, 1326507024  ;;  %v714_v63 = vshll.u32 %v1227_v2, %v708_v37 }
 0x1c3   :  { %v632_v61 = vsel %vm624_vm4, %v615_v51, %v631_v43  ;;  %v636_v42 = vsel %vm624_vm4, %v618_v40, %v635_v59  ;;  %v629_v3 = vsel %vm623_vm3, %v626_v54, %v628_v58  ;;  %v715_v7 = vshrl.u32 %v1228_v4, %v709_v53 }
 0x1c4   :  { %v633_v38 = vsel %vm623_vm3, %v630_v56, %v632_v61  ;;  %v637_v5 = vsel %vm623_vm3, %v634_v57, %v636_v42  ;;  %v713_v14 = vor.u32 %v712_v36, %v711_v60  ;;  %v717_v2 = vshll.u32 %v1228_v4, %v708_v37 }
 0x1c5   :  { %v1433_v18 = vmul.u32.u64.low %v1407_v30, %v637_v5  ;;  %v1434_v10 = vmul.u32.u64.high %v1407_v30, %v637_v5, %v1433_v18  ;;  %v1437_v11 = vmul.u32.u64.low %v1407_v30, %v633_v38  ;;  %v1438_v12 = vmul.u32.u64.high %v1407_v30, %v633_v38, %v1437_v11 }
 0x1c6   :  { %v716_v22 = vor.u32 %v715_v7, %v714_v63  ;;  %v718_v23 = vshrl.u32 %v1229_v6, %v709_v53  ;;  %v720_v24 = vshll.u32 %v1229_v6, %v708_v37  ;;  %v721_v1 = vshrl.u32 %v1230_v8, %v709_v53 }
 0x1c7   :  { %v724_v25 = vshrl.u32 %v1231_v21, %v709_v53  ;;  %v645_v27 = vmul.u32 %v1407_v30, %v629_v3  ;;  %v710_v28 = vshrl.u32 %v1226_v62, %v709_v53  ;;  %v723_v32 = vshll.u32 %v1230_v8, %v708_v37 }
 0x1c8   :  { %v719_v29 = vor.u32 %v718_v23, %v717_v2  ;;  %vm647_vm6 = vc.u32 %v1434_v10, %v1437_v11  ;;  %v648_v4 = vadd.s32 1, %v1438_v12  ;;  %v722_v34 = vor.u32 %v721_v1, %v720_v24 }
 0x1c9   :  { %vm726_vm7 = vcmp.lt.s32.totalorder %v1410_v35, 1  ;;  %v725_v6 = vor.u32 %v724_v25, %v723_v32  ;;  %vm728_vm8 = vcmp.lt.s32.totalorder %v1410_v35, 3  ;;  %vm729_vm9 = vcmp.lt.s32.totalorder %v1410_v35, 4 }
 0x1ca   :  { %v734_v21 = vsel %vm726_vm7, %v713_v14, %v716_v22  ;;  %v649_v30 = vsel %vm647_vm6, %v648_v4, %v1438_v12  ;;  %v731_v31 = vsel %vm729_vm9, %v719_v29, 2102212464  ;;  %v735_v62 = vsel %vm729_vm9, %v722_v34, 920167782 }
 0x1cb   :  { %v738_v41 = vsel %vm726_vm7, %v716_v22, %v719_v29  ;;  %v650_v19 = vadd.s32 %v649_v30, %v645_v27  ;;  %vm727_vm10 = vcmp.lt.s32.totalorder %v1410_v35, 2  ;;  %v736_v8 = vsel %vm728_vm8, %v719_v29, %v735_v62 }
 0x1cc   :  { %v739_v37 = vsel %vm729_vm9, %v725_v6, 1326507024  ;;  %v730_v49 = vsel %vm726_vm7, %v710_v28, %v713_v14  ;;  %v732_v50 = vsel %vm728_vm8, %v716_v22, %v731_v31  ;;  %v737_v44 = vsel %vm727_vm10, %v734_v21, %v736_v8 }
 0x1cd   :  { %v740_v33 = vsel %vm728_vm8, %v722_v34, %v739_v37  ;;  %v651_v0 = vadd.s32 536870912, %v650_v19  ;;  %v1455_v46 = vmul.u32.u64.low %v742_v26, %v737_v44  ;;  %v1456_v47 = vmul.u32.u64.high %v742_v26, %v737_v44, %v1455_v46 }
 0x1ce   :  { %v741_v45 = vsel %vm727_vm10, %v738_v41, %v740_v33  ;;  %v733_v53 = vsel %vm727_vm10, %v730_v49, %v732_v50  ;;  %v646_v38 = vadd.s32 %v1437_v11, %v1434_v10  ;;  %vm682_vm6 = vweird.f32 %v1395_v39 }
 0x1cf   :  { %v1458_v48 = vmul.u32.u64.low %v742_v26, %v741_v45  ;;  %v1459_v17 = vmul.u32.u64.high %v742_v26, %v741_v45, %v1458_v48  ;;  %v652_v51 = vshrl.u32 %v651_v0, 30  ;;  %v752_v20 = vadd.s32 1, %v1456_v47 }
 0x1d0   :  { %v749_v35 = vmul.u32 %v742_v26, %v733_v53  ;;  %vm786_vm9 = vweird.f32 %v1397_v52 }
 0x1d1   :  { %v653_v40 = vshll.u32 %v652_v51, 30  ;;  %vm751_vm11 = vc.u32 %v1459_v17, %v1455_v46  ;;  %v750_v29 = vadd.s32 %v1455_v46, %v1459_v17  ;;  %v676_v11 = vsub.s32 4, %v652_v51 }
 0x1d2   :  { %v753_v55 = vsel %vm751_vm11, %v752_v20, %v1456_v47  ;;  %v588_v47 = vmul.f32 %v1395_v39, %v1395_v39  ;;  %v1476_v20 = vpop.permute.xlu1 %1014 }
 0x1d3   :  { %v654_v54 = vsub.s32 %v650_v19, %v653_v40  ;;  %v754_v56 = vadd.s32 %v753_v55, %v749_v35  ;;  %v677_v19 = vsel %vm592_vm14, %v676_v11, %v652_v51 }
 0x1d4   :  { %v679_v49 = vsel %vm591_vm15, 0, %v677_v19  ;;  %v1232_v19 = vmov 1966171168  }
 0x1d5   :  { %v656_v57 = vsub.s32 0, %v654_v54  ;;  %v755_v58 = vadd.s32 536870912, %v754_v56  ;;  %v683_v45 = vadd.s32 3, %v679_v49  ;;  %v891_v53 = vand.u32 3, %v679_v49 }
 0x1d7   :  { %v1114_v43 = vmin.u32 %v656_v57, %v654_v54  ;;  %v756_v59 = vshrl.u32 %v755_v58, 30  ;;  %v684_v17 = vand.u32 3, %v683_v45  ;;  %vm893_vm3 = vcmp.eq.s32.totalorder %v891_v53, 0 }
 0x1d8   :  { %vm896_vm4 = vcmp.eq.s32.totalorder %v891_v53, 2  ;;  %vm892_vm8 = vcmp.lt.s32.totalorder %v891_v53, 2 }
 0x1d9   :  { %v658_v60 = vclz %v1114_v43  ;;  %v757_v61 = vshll.u32 %v756_v59, 30  ;;  %v780_v0 = vsub.s32 4, %v756_v59  ;;  %vm689_vm2 = vcmp.eq.s32.totalorder %v684_v17, 2 }
 0x1da   :  { %vm686_vm5 = vcmp.eq.s32.totalorder %v684_v17, 0  ;;  %vm685_vm7 = vcmp.lt.s32.totalorder %v684_v17, 2 }
 0x1db   :  { %v1115_v42 = vadd.s32 4294967294, %v658_v60  ;;  %v758_v36 = vsub.s32 %v754_v56, %v757_v61  ;;  %v781_v48 = vsel %vm696_vm0, %v780_v0, %v756_v59  ;;  %v1019_v56 = vmul.f32 %v1476_v20, %v588_v47 }
 0x1dc   :  { %v783_v35 = vsel %vm695_vm1, 0, %v781_v48 }
 0x1dd   :  { %vm1116_vm12 = vcmp.lt.s32.totalorder %v1115_v42, 0  ;;  %v760_v3 = vsub.s32 0, %v758_v36  ;;  %v787_v58 = vadd.s32 3, %v783_v35 }
 0x1de   :  { %v661_v63 = vsel %vm1116_vm12, 0, %v1115_v42  ;;  %v1006_v42 = vrot.slane %v1395_v39, 1 }
 0x1df   :  { %v662_v5 = vsub.s32 32, %v661_v63  ;;  %v666_v7 = vsub.s32 4294967266, %v661_v63  ;;  %v1118_v18 = vmin.u32 %v760_v3, %v758_v36  ;;  %v663_v12 = vshll.u32 %v654_v54, %v661_v63 }
 0x1e0   :  { %v589_v63 = vmul.f32 %v1397_v52, %v1397_v52 }
 0x1e1   :  { %v664_v14 = vshrl.u32 %v646_v38, %v662_v5  ;;  %v667_v22 = vadd.s32 127, %v666_v7  ;;  %v762_v2 = vclz %v1118_v18  ;;  %v1023_v5 = vrot.slane %v1019_v56, 1 }
 0x1e2   :  { %v788_v7 = vand.u32 3, %v787_v58  ;;  %v994_v18 = vand.u32 3, %v783_v35 }
 0x1e3   :  { %v665_v23 = vor.u32 %v664_v14, %v663_v12  ;;  %v668_v24 = vshll.u32 %v667_v22, 23  ;;  %v1119_v1 = vadd.s32 4294967294, %v762_v2  ;;  %v1017_v14 = vmul.f32 %v1476_v20, %v1395_v39 }
 0x1e4   :  { %vm793_vm10 = vcmp.eq.s32.totalorder %v788_v7, 2  ;;  %vm996_vm11 = vcmp.eq.s32.totalorder %v994_v18, 0  ;;  %vm999_vm12 = vcmp.eq.s32.totalorder %v994_v18, 2 }
 0x1e5   :  { %v669_v25 = vor.u32 4788187, %v668_v24  ;;  %vm1120_vm13 = vcmp.lt.s32.totalorder %v1119_v1, 0  ;;  %v672_v27 = vcvt.s32.f32 %v665_v23  ;;  %v1010_v23 = vmul.f32 %v1006_v42, %v1395_v39 }
 0x1e6   :  { %v765_v28 = vsel %vm1120_vm13, 0, %v1119_v1  ;;  %vm790_vm13 = vcmp.eq.s32.totalorder %v788_v7, 0 }
 0x1e7   :  { %v670_v26 = vand.u32 2147483647, %v669_v25  ;;  %v766_v32 = vsub.s32 32, %v765_v28  ;;  %v770_v4 = vsub.s32 4294967266, %v765_v28  ;;  %v767_v34 = vshll.u32 %v758_v36, %v765_v28 }
 0x1e8   :  { %v1007_v36 = vrot.slane %v1397_v52, 1 }
 0x1e9   :  { %v673_v10 = vmul.f32 %v672_v27, %v670_v26  ;;  %v768_v6 = vshrl.u32 %v750_v29, %v766_v32  ;;  %v771_v21 = vadd.s32 127, %v770_v4  ;;  %v1020_v26 = vmul.f32 %v1476_v20, %v589_v63 }
 0x1ea   :  { %v1011_v24 = vmul.f32 %v1007_v36, %v1397_v52  ;;  %v1027_v27 = vadd.f32 %v1023_v5, %v1017_v14 }
 0x1eb   :  { %v674_v30 = vxor.u32 2147483648, %v673_v10  ;;  %v769_v31 = vor.u32 %v768_v6, %v767_v34  ;;  %v772_v62 = vshll.u32 %v771_v21, 23  ;;  %v1024_v21 = vrot.slane %v1020_v26, 1 }
 0x1ed   :  { %v675_v41 = vsel %vm592_vm14, %v674_v30, %v673_v10  ;;  %v773_v37 = vor.u32 4788187, %v772_v62  ;;  %v776_v44 = vcvt.s32.f32 %v769_v31  ;;  %vm789_vm14 = vcmp.lt.s32.totalorder %v788_v7, 2 }
 0x1ee   :  { %v678_v8 = vsel %vm591_vm15, %v1395_v39, %v675_v41  ;;  %vm995_vm15 = vcmp.lt.s32.totalorder %v994_v18, 2  ;;  %v1018_v41 = vmul.f32 %v1476_v20, %v1397_v52 }
 0x1ef   :  { %1184 = vcosq.f32 %v678_v8  ;;  %v774_v50 = vand.u32 2147483647, %v773_v37 }
 0x1f0   :  { %1186 = vsinq.f32 %v678_v8  ;;  %v1063_v8 = vunpack.c.l.s4 %v1232_v19 }
 0x1f1   :  { %v777_v33 = vmul.f32 %v776_v44, %v774_v50  ;;  %v1049_v44 = vmul.f32 %v1476_v20, %v1010_v23 }
 0x1f2   :  { %v1064_v17 = vunpack.c.0.s8 %v1063_v8 }
 0x1f3   :  { %v778_v46 = vxor.u32 2147483648, %v777_v33  ;;  %v1053_v48 = vrot.slane %v1049_v44, 4 }
 0x1f4   :  { %v1067_v35 = vsub.s32 %v1064_v17, %v1257_v16 }
 0x1f5   :  { %v779_v9 = vsel %vm696_vm0, %v778_v46, %v777_v33  ;;  %v1028_v33 = vadd.f32 %v1024_v21, %v1018_v41  ;;  %v1050_v46 = vmul.f32 %v1476_v20, %v1011_v24  ;;  %vm1079_vm0 = vcmp.lt.s32.totalorder %v35_v15, 256 }
 0x1f6   :  { %v782_v51 = vsel %vm695_vm1, %v1397_v52, %v779_v9 }
 0x1f7   :  { %1188 = vcosq.f32 %v782_v51  ;;  %v1054_v52 = vrot.slane %v1050_v46, 4 }
 0x1f8   :  { %1190 = vsinq.f32 %v782_v51 }
 0x1f9   :  { %v1185_v40 = vpop.eup %1184 }
 0x1fa   :  { %v1187_v54 = vpop.eup %1186  ;;  %v690_v55 = vxor.u32 2147483648, %v1185_v40 }
 0x1fb   :  { %v687_v57 = vxor.u32 2147483648, %v1187_v54 }
 0x1fc   :  { %v691_v13 = vsel %vm689_vm2, %v690_v55, %v1187_v54  ;;  %v898_v43 = vsel %vm896_vm4, %v690_v55, %v1187_v54 }
 0x1fd   :  { %v688_v59 = vsel %vm686_vm5, %v1185_v40, %v687_v57  ;;  %v895_v60 = vsel %vm893_vm3, %v1185_v40, %v687_v57 }
 0x1fe   :  { %v692_v61 = vsel %vm685_vm7, %v688_v59, %v691_v13  ;;  %v899_v38 = vsel %vm892_vm8, %v895_v60, %v898_v43 }
 0x1ff   :  { %v693_v3 = vsel %vm682_vm6, nan, %v692_v61  ;;  %v900_v2 = vsel %vm682_vm6, nan, %v899_v38 }
 0x200   :  { %v1029_v12 = vmul.f32 %v1476_v20, %v693_v3  ;;  %v1039_v10 = vmul.f32 %v1476_v20, %v900_v2 }
 0x201   :  { %v1189_v22 = vpop.eup %1188 }
 0x202   :  { %v1191_v1 = vpop.eup %1190  ;;  %v794_v25 = vxor.u32 2147483648, %v1189_v22  ;;  %v1033_v28 = vrot.slane %v1029_v12, 2  ;;  %v1043_v50 = vrot.slane %v1039_v10, 3 }
 0x203   :  { %v791_v29 = vxor.u32 2147483648, %v1191_v1 }
 0x204   :  { %v795_v32 = vsel %vm793_vm10, %v794_v25, %v1191_v1  ;;  %v1001_v4 = vsel %vm999_vm12, %v794_v25, %v1191_v1  ;;  %v1037_v30 = vadd.f32 %v1033_v28, %v1027_v27 }
 0x205   :  { %v792_v11 = vsel %vm790_vm13, %v1189_v22, %v791_v29  ;;  %v998_v39 = vsel %vm996_vm11, %v1189_v22, %v791_v29 }
 0x206   :  { %v796_v34 = vsel %vm789_vm14, %v792_v11, %v795_v32  ;;  %v1002_v6 = vsel %vm995_vm15, %v998_v39, %v1001_v4  ;;  %v1047_v45 = vadd.f32 %v1043_v50, %v1037_v30 }
 0x207   :  { %v797_v31 = vsel %vm786_vm9, nan, %v796_v34  ;;  %v1003_v62 = vsel %vm786_vm9, nan, %v1002_v6 }
 0x208   :  { %v1030_v37 = vmul.f32 %v1476_v20, %v797_v31  ;;  %v1040_v49 = vmul.f32 %v1476_v20, %v1003_v62  ;;  %v1057_v53 = vadd.f32 %v1053_v48, %v1047_v45 }
 0x20a   :  { %v1034_v0 = vrot.slane %v1030_v37, 2  ;;  %v1044_v9 = vrot.slane %v1040_v49, 3 }
 0x20c   :  { %v1038_v47 = vadd.f32 %v1034_v0, %v1028_v33 }
 0x20e   :  { %v1048_v51 = vadd.f32 %v1044_v9, %v1038_v47 }
 0x210   :  { %v1058_v40 = vadd.f32 %v1054_v52, %v1048_v51 }
 0x212   :  { %v1061_v54 = vcombine.low %v1057_v53, %v1058_v40 }
 0x214   :  { %v1068_v55 = vrot.slane %v1061_v54, %v1067_v35 }
 0x216   :  { %v1075_v56 = vrot.slane %v1068_v55, %v1067_v35 }
 0x218   :  { %1081 = vst.msk [vmem:[#allocation2] sm:$0x3] %vm1079_vm0, %v1075_v56 }
 0x219   :  { %1203 = shalt.err (!%p1200_p4)
}
 0x21a   :  { %s1204_s18 = scalar_lea.hbm %s1522_s2, 32 }
 0x21b   :  { %p1205_p5 = scmp.ne.s32.totalorder %s1522_s2, %s1204_s18  ;;  %p1208_p6 = scmp.lt.u32.totalorder %s1204_s18, %s1522_s2 }
 0x21d   :  { %p1210_p7 = pnand %p1208_p6, %p1205_p5 }
 0x21f   :  { %1213 = shalt.err (!%p1210_p7)
}
 0x220   :  { %1091 = dma.vmem_to_hbm [thread:$0]  %s1089_s14, 32, %s1522_s2, [#allocation3]  }
 0x221   :  { %1214 = dma.done.wait [#allocation3], 32  }
 0x222   :  { %1215 = vsyncadd [#allocation3], 4294967264 }
 0x223   :  { %1095 = vsyncpa [#allocation3], 1 }

</bundles_post_ra>
